<compile_context>
chip_gen: v7x
topology: tpu7x:2x2x1
jax: 0.10.0
libtpu: 0.0.40
codegen_flags: <defaults>
</compile_context>

<pallas_src>
import functools

import jax
import jax.numpy as jnp
from jax.experimental import pallas as pl
from jax.experimental.pallas import tpu as pltpu


# ----------------------------------------------------------------------------- helpers
def _round_up(n: int, m: int) -> int:
    return ((n + m - 1) // m) * m


def _cdiv(a: int, b: int) -> int:
    return -(-a // b)


def compute_layer_sizes(input_size: int, output_size: int, factor: int):
    """Reproduces the layer-size construction loop from VeryBasicMLP.__init__."""
    hidden_layers = [input_size]
    while input_size - factor > output_size:
        hidden_layers.append(input_size - factor)
        factor += factor
    hidden_layers.append(output_size)
    return hidden_layers


# ----------------------------------------------------------------------------- kernel
def make_mlp_kernel(num_layers: int, lane: int, in_dim: int, out_dim: int):
    """Fused MLP kernel. refs = (x_tile, weight_slab, bias_slab, out_tile).

    weight_slab (bf16): rows [i*lane : (i+1)*lane] hold padded weight_i (lane, lane);
                        only the first in_dim rows of block 0 are ever read.
    bias_slab   (f32):  row i holds padded bias_i (lane,).
    """

    def kernel(x_ref, w_ref, b_ref, o_ref):
        h = x_ref[...].astype(jnp.bfloat16)                   # (TB, in_dim) bf16
        h32 = None
        for i in range(num_layers):
            rows = in_dim if i == 0 else lane                 # contraction width
            w = w_ref[pl.ds(i * lane, rows), :]               # static bf16 view
            b = b_ref[pl.ds(i, 1), :]                         # (1, lane) f32
            h32 = jnp.dot(h, w, preferred_element_type=jnp.float32) + b   # MXU, f32 acc
            h32 = jnp.maximum(h32, 0.0)                       # F.relu (f32 epilogue)
            if i < num_layers - 1:
                h = h32.astype(jnp.bfloat16)                  # bf16 operands for next pass
        o_ref[...] = h32[:, :out_dim].astype(o_ref.dtype)     # narrow f32 store

    return kernel


# ----------------------------------------------------------------------------- packing
def pack_weights(weights, lane: int, dtype=jnp.bfloat16):
    """Zero-pad every weight to (lane, lane) and stack into one bf16 slab."""
    blocks = []
    for w in weights:
        fi, fo = w.shape
        blocks.append(jnp.zeros((lane, lane), jnp.float32).at[:fi, :fo].set(w))
    return jnp.concatenate(blocks, axis=0).astype(dtype)


def pack_biases(biases, lane: int):
    """Zero-pad every bias to (lane,) and stack into one small f32 array."""
    bp = jnp.zeros((len(biases), lane), jnp.float32)
    for i, b in enumerate(biases):
        bp = bp.at[i, : b.size].set(b.reshape(-1))
    return bp


# ----------------------------------------------------------------------------- wrapper
@functools.partial(jax.jit, static_argnames=("block_batch",))
def very_basic_mlp_pallas(x, weights, biases, *, block_batch: int = 2048):
    """x: (B, input_size) f32; weights[i]: (in_i, out_i) f32; biases[i]: (1, out_i) f32."""
    B, in_dim = x.shape
    num_layers = len(weights)
    out_dim = weights[-1].shape[1]
    sizes = [w.shape[0] for w in weights] + [out_dim]
    lane = _round_up(max(sizes), 128)                  # common padded feature width (128)

    w_slab = pack_weights(weights, lane)               # (num_layers*lane, lane) bf16
    b_slab = pack_biases(biases, lane)                 # (num_layers, lane)      f32
    p_rows = w_slab.shape[0]

    # --- batch tiling: tight B_pad, >= 2 (even) grid steps once there's enough work,
    #     so v7x's two TensorCores both get a share of the "parallel" batch axis.
    n_steps = max(1, _cdiv(B, block_batch))
    if n_steps == 1 and B >= 256:
        n_steps = 2
    if n_steps > 1 and n_steps % 2:
        n_steps += 1
    if n_steps == 1:
        TB = B                                         # full-extent block: no padding at all
    else:
        TB = _round_up(_cdiv(B, n_steps), 8)
    B_pad = TB * n_steps

    x_in = x if B_pad == B else jnp.pad(x, ((0, B_pad - B), (0, 0)))

    flops = 2 * B * sum(w.shape[0] * w.shape[1] for w in weights)
    bytes_accessed = (B_pad * in_dim * 4 + w_slab.size * 2 + b_slab.size * 4
                      + B_pad * out_dim * 4)

    out = pl.pallas_call(
        make_mlp_kernel(num_layers, lane, in_dim, out_dim),
        out_shape=jax.ShapeDtypeStruct((B_pad, out_dim), jnp.float32),
        grid_spec=pltpu.PrefetchScalarGridSpec(
            num_scalar_prefetch=0,
            grid=(n_steps,),
            in_specs=[
                pl.BlockSpec((TB, in_dim), lambda i: (i, 0)),        # unpadded activations
                pl.BlockSpec((p_rows, lane), lambda i: (0, 0)),      # resident bf16 weights
                pl.BlockSpec((num_layers, lane), lambda i: (0, 0)),  # resident f32 biases
            ],
            out_specs=pl.BlockSpec((TB, out_dim), lambda i: (i, 0)), # narrow f32 output
        ),
        compiler_params=pltpu.CompilerParams(
            dimension_semantics=("parallel",),                       # megacore-friendly
            vmem_limit_bytes=32 * 1024 * 1024,                       # portable to v7x
        ),
        cost_estimate=pl.CostEstimate(
            flops=flops, transcendentals=0, bytes_accessed=bytes_accessed
        ),
    )(x_in, w_slab, b_slab)

    return out if B_pad == B else out[:B]


# ----------------------------------------------------------------------------- init / refs
def init_params(key, layer_sizes):
    """Matches PyTorch nn.Linear default init: U(-1/sqrt(fan_in), 1/sqrt(fan_in)).
    Weights are stored already transposed as (in, out)."""
    weights, biases = [], []
    for i in range(len(layer_sizes) - 1):
        fan_in, fan_out = layer_sizes[i], layer_sizes[i + 1]
        key, wk, bk = jax.random.split(key, 3)
        bound = 1.0 / jnp.sqrt(jnp.float32(fan_in))
        weights.append(jax.random.uniform(wk, (fan_in, fan_out), jnp.float32, -bound, bound))
        biases.append(jax.random.uniform(bk, (1, fan_out), jnp.float32, -bound, bound))
    return weights, biases


def reference_forward_f32(x, weights, biases):
    h = x
    for w, b in zip(weights, biases):
        h = jnp.maximum(h @ w + b, 0.0)
    return h


def reference_forward_mixed(x, weights, biases):
    """Mirrors the kernel's dtype path: bf16 matmul operands, f32 bias/accumulate/epilogue."""
    h = x.astype(jnp.bfloat16)
    h32 = None
    for i, (w, b) in enumerate(zip(weights, biases)):
        h32 = jnp.dot(h, w.astype(jnp.bfloat16), preferred_element_type=jnp.float32) + b
        h32 = jnp.maximum(h32, 0.0)
        if i < len(weights) - 1:
            h = h32.astype(jnp.bfloat16)
    return h32


# ----------------------------------------------------------------------------- main
if __name__ == "__main__":
    input_size, output_size, factor = 32, 8, 4
    batch = 2

    layer_sizes = compute_layer_sizes(input_size, output_size, factor)
    # [32, 28, 24, 16, 8] -> 4 Linear layers

    key = jax.random.PRNGKey(0)
    key, xk = jax.random.split(key)
    x = jax.random.normal(xk, (batch, input_size), jnp.float32)
    weights, biases = init_params(key, layer_sizes)

    out = very_basic_mlp_pallas(x, weights, biases)
    out = jax.block_until_ready(out)

    assert out.shape == (batch, output_size), out.shape

    # Primary check: dtype-matched (bf16 weights/operands, f32 bias + accumulate) reference.
    ref_mixed = reference_forward_mixed(x, weights, biases)
    assert jnp.allclose(out, ref_mixed, atol=1e-3, rtol=1e-3), "mismatch vs mixed-precision reference"

    # Sanity check: full-f32 reference within bf16-induced tolerance.
    ref_f32 = reference_forward_f32(x, weights, biases)
    assert jnp.allclose(out, ref_f32, atol=3e-2, rtol=3e-2), "mismatch vs f32 reference"

    print("KERNEL_OK")
</pallas_src>

<mosaic_0001>
module attributes {stable_mosaic.version = 11 : i64} {
  func.func @kernel(%arg0: i32, %arg1: memref<2x32xf32, #tpu.memory_space<vmem>>, %arg2: memref<512x128xbf16, #tpu.memory_space<vmem>>, %arg3: memref<4x128xf32, #tpu.memory_space<vmem>>, %arg4: memref<2x8xf32, #tpu.memory_space<vmem>>) attributes {dimension_semantics = [#tpu.dimension_semantics<parallel>], iteration_bounds = array<i64: 1>, scalar_prefetch = 0 : i64, scratch_operands = 0 : i64, tpu.core_type = #tpu.core_type<tc>, window_params = [{transform_indices = @transform_0, window_bounds = array<i64: 2, 32>}, {pipeline_mode = #tpu.pipeline_mode<synchronous>, transform_indices = @transform_1, window_bounds = array<i64: 512, 128>}, {pipeline_mode = #tpu.pipeline_mode<synchronous>, transform_indices = @transform_2, window_bounds = array<i64: 4, 128>}, {transform_indices = @transform_3, window_bounds = array<i64: 2, 8>}]} {
    %c0 = arith.constant 0 : index
    %c0_0 = arith.constant 0 : index
    %0 = vector.load %arg1[%c0, %c0_0] : memref<2x32xf32, #tpu.memory_space<vmem>>, vector<2x32xf32>
    %1 = arith.truncf %0 : vector<2x32xf32> to vector<2x32xbf16>
    %c0_1 = arith.constant 0 : index
    %c0_2 = arith.constant 0 : index
    %2 = vector.load %arg2[%c0_1, %c0_2] : memref<512x128xbf16, #tpu.memory_space<vmem>>, vector<32x128xbf16>
    %c0_3 = arith.constant 0 : index
    %c0_4 = arith.constant 0 : index
    %3 = vector.load %arg3[%c0_3, %c0_4] : memref<4x128xf32, #tpu.memory_space<vmem>>, vector<1x128xf32>
    %cst = arith.constant dense<0.000000e+00> : vector<2x128xf32>
    %4 = tpu.matmul %1, %2, %cst {dimension_numbers = #tpu.dot_dimension_numbers<[1], [0], [0], [1], [0, 0, 1, 1], [], []>} : vector<2x32xbf16>, vector<32x128xbf16>, vector<2x128xf32> -> vector<2x128xf32>
    %5 = vector.broadcast %3 : vector<1x128xf32> to vector<2x128xf32>
    %6 = arith.addf %4, %5 : vector<2x128xf32>
    %cst_5 = arith.constant 0.000000e+00 : f32
    %7 = vector.broadcast %cst_5 : f32 to vector<2x128xf32>
    %8 = arith.maximumf %6, %7 : vector<2x128xf32>
    %9 = arith.truncf %8 : vector<2x128xf32> to vector<2x128xbf16>
    %c128 = arith.constant 128 : index
    %c0_6 = arith.constant 0 : index
    %10 = vector.load %arg2[%c128, %c0_6] : memref<512x128xbf16, #tpu.memory_space<vmem>>, vector<128x128xbf16>
    %c1 = arith.constant 1 : index
    %c0_7 = arith.constant 0 : index
    %11 = vector.load %arg3[%c1, %c0_7] : memref<4x128xf32, #tpu.memory_space<vmem>>, vector<1x128xf32>
    %cst_8 = arith.constant dense<0.000000e+00> : vector<2x128xf32>
    %12 = tpu.matmul %9, %10, %cst_8 {dimension_numbers = #tpu.dot_dimension_numbers<[1], [0], [0], [1], [0, 0, 1, 1], [], []>} : vector<2x128xbf16>, vector<128x128xbf16>, vector<2x128xf32> -> vector<2x128xf32>
    %13 = vector.broadcast %11 : vector<1x128xf32> to vector<2x128xf32>
    %14 = arith.addf %12, %13 : vector<2x128xf32>
    %cst_9 = arith.constant 0.000000e+00 : f32
    %15 = vector.broadcast %cst_9 : f32 to vector<2x128xf32>
    %16 = arith.maximumf %14, %15 : vector<2x128xf32>
    %17 = arith.truncf %16 : vector<2x128xf32> to vector<2x128xbf16>
    %c256 = arith.constant 256 : index
    %c0_10 = arith.constant 0 : index
    %18 = vector.load %arg2[%c256, %c0_10] : memref<512x128xbf16, #tpu.memory_space<vmem>>, vector<128x128xbf16>
    %c2 = arith.constant 2 : index
    %c0_11 = arith.constant 0 : index
    %19 = vector.load %arg3[%c2, %c0_11] : memref<4x128xf32, #tpu.memory_space<vmem>>, vector<1x128xf32>
    %cst_12 = arith.constant dense<0.000000e+00> : vector<2x128xf32>
    %20 = tpu.matmul %17, %18, %cst_12 {dimension_numbers = #tpu.dot_dimension_numbers<[1], [0], [0], [1], [0, 0, 1, 1], [], []>} : vector<2x128xbf16>, vector<128x128xbf16>, vector<2x128xf32> -> vector<2x128xf32>
    %21 = vector.broadcast %19 : vector<1x128xf32> to vector<2x128xf32>
    %22 = arith.addf %20, %21 : vector<2x128xf32>
    %cst_13 = arith.constant 0.000000e+00 : f32
    %23 = vector.broadcast %cst_13 : f32 to vector<2x128xf32>
    %24 = arith.maximumf %22, %23 : vector<2x128xf32>
    %25 = arith.truncf %24 : vector<2x128xf32> to vector<2x128xbf16>
    %c384 = arith.constant 384 : index
    %c0_14 = arith.constant 0 : index
    %26 = vector.load %arg2[%c384, %c0_14] : memref<512x128xbf16, #tpu.memory_space<vmem>>, vector<128x128xbf16>
    %c3 = arith.constant 3 : index
    %c0_15 = arith.constant 0 : index
    %27 = vector.load %arg3[%c3, %c0_15] : memref<4x128xf32, #tpu.memory_space<vmem>>, vector<1x128xf32>
    %cst_16 = arith.constant dense<0.000000e+00> : vector<2x128xf32>
    %28 = tpu.matmul %25, %26, %cst_16 {dimension_numbers = #tpu.dot_dimension_numbers<[1], [0], [0], [1], [0, 0, 1, 1], [], []>} : vector<2x128xbf16>, vector<128x128xbf16>, vector<2x128xf32> -> vector<2x128xf32>
    %29 = vector.broadcast %27 : vector<1x128xf32> to vector<2x128xf32>
    %30 = arith.addf %28, %29 : vector<2x128xf32>
    %cst_17 = arith.constant 0.000000e+00 : f32
    %31 = vector.broadcast %cst_17 : f32 to vector<2x128xf32>
    %32 = arith.maximumf %30, %31 : vector<2x128xf32>
    %33 = vector.extract_strided_slice %32 {offsets = [0, 0], sizes = [2, 8], strides = [1, 1]} : vector<2x128xf32> to vector<2x8xf32>
    %c0_18 = arith.constant 0 : index
    %c0_19 = arith.constant 0 : index
    %34 = vector.load %arg4[%c0_18, %c0_19] : memref<2x8xf32, #tpu.memory_space<vmem>>, vector<2x8xf32>
    tpu.vector_store %arg4[%c0_18, %c0_19], %33 {strides = array<i32>} : memref<2x8xf32, #tpu.memory_space<vmem>>, vector<2x8xf32>,
    return
  }
  func.func @transform_0(%arg0: i32) -> (i32, i32) {
    %c0_i32 = arith.constant 0 : i32
    %c0_i32_0 = arith.constant 0 : i32
    return %arg0, %c0_i32 : i32, i32
  }
  func.func @transform_1(%arg0: i32) -> (i32, i32) {
    %c0_i32 = arith.constant 0 : i32
    %c0_i32_0 = arith.constant 0 : i32
    %c0_i32_1 = arith.constant 0 : i32
    return %c0_i32, %c0_i32_0 : i32, i32
  }
  func.func @transform_2(%arg0: i32) -> (i32, i32) {
    %c0_i32 = arith.constant 0 : i32
    %c0_i32_0 = arith.constant 0 : i32
    %c0_i32_1 = arith.constant 0 : i32
    return %c0_i32, %c0_i32_0 : i32, i32
  }
  func.func @transform_3(%arg0: i32) -> (i32, i32) {
    %c0_i32 = arith.constant 0 : i32
    %c0_i32_0 = arith.constant 0 : i32
    return %arg0, %c0_i32 : i32, i32
  }
}

</mosaic_0001>

<bundles_post_ra>
// kernel: very_basic_mlp_pallas.1
= control target key start
LH: loop header
LB: loop body
LE: loop exit
PB: predicated region body
PF: predicated region fallthrough
CT: control target
= control target key end

     0   :  { %v615_v1 = vmov 0.0   ;;  %vm616_vm0 = vmmov 0   ;;  %vm39_vm1 = vcmask 261120   ;;  %s777_s0 = inlined_call_operand.vmem [shape: f32[2,32], index: 0, kind: input, shape index: {}]   ;;  %s778_s1 = inlined_call_operand.vmem [shape: bf16[512,128], index: 1, kind: input, shape index: {}]   ;;  %s779_s2 = inlined_call_operand.vmem [shape: f32[4,128], index: 2, kind: input, shape index: {}]   ;;  %s780_s3 = inlined_call_operand.hbm [shape: f32[2,8], index: 3, kind: output, shape index: {}]  }
   0x1   :  { %v565_v0 = vld [vmem:[%s778_s1] sm:$0xff]   ;;  %494 = vmatprep.subr.bf16.mxu0 %v615_v1  ;;  %v566_v2 = vld [vmem:[%s778_s1 + $0x8] sm:$0xff]   ;;  %502 = vmatprep.subr.bf16.mxu1 %v615_v1  ;;  %v569_v7 = vld [vmem:[%s778_s1 + $0x50] sm:$0xff]  }
   0x2   :  { %495 = vmatpush3.bf16.msra.mxu0 %v565_v0  ;;  %498 = vmatprep.mubr.msk.bf16.mxu0 %vm616_vm0, %v615_v1  ;;  %v16_v3 = vld [vmem:[%s777_s0] sm:$0x3]  ;;  %v568_v5 = vld [vmem:[%s778_s1 + $0x48] sm:$0xff]   ;;  %v570_v8 = vld [vmem:[%s778_s1 + $0x58] sm:$0xff]  }
   0x3   :  { %v567_v4 = vld [vmem:[%s778_s1 + $0x40] sm:$0xff]   ;;  %496 = vmatprep.subr.bf16.mxu0 %v615_v1  ;;  %518 = vmatprep.mubr.msk.bf16.mxu1 %vm616_vm0, %v615_v1  ;;  %v17_v6 = vpack.c.bf16 %v16_v3, %v16_v3  ;;  %v572_v10 = vld [vmem:[%s778_s1 + $0x68] sm:$0xff]  }
   0x4   :  { %503 = vmatpush3.bf16.msra.mxu1 %v567_v4  ;;  %v571_v9 = vld [vmem:[%s778_s1 + $0x60] sm:$0xff]  }
   0x5   :  { %504 = vmatprep.subr.bf16.mxu1 %v615_v1 }
   0x6   :  { %497 = vmatpush3.bf16.msra.mxu0 %v566_v2 }
   0x7   :  { %522 = vmatprep.subr.bf16.mxu0 %v615_v1 }
   0x8   :  { %505 = vmatpush3.bf16.msra.mxu1 %v568_v5 }
   0x9   :  { %499 = vmatmul.mubr.msk.bf16.vlgmr.msra.gmra.mrb[0].mxu0 %vm39_vm1, %v17_v6  ;;  %506 = vmatprep.subr.bf16.mxu1 %v615_v1 }
   0xa   :  { %538 = vmatprep.mubr.msk.bf16.mxu0 %vm616_vm0, %v615_v1 }
   0xc   :  { %507 = vmatpush3.bf16.msra.mxu1 %v569_v7 }
   0xd   :  { %508 = vmatprep.subr.bf16.mxu1 %v615_v1 }
  0x10   :  { %509 = vmatpush3.bf16.msra.mxu1 %v570_v8 }
  0x11   :  { %510 = vmatprep.subr.bf16.mxu1 %v615_v1 }
  0x14   :  { %511 = vmatpush3.bf16.msra.mxu1 %v571_v9 }
  0x15   :  { %8 = vsyncpa [#allocation3], 0  ;;  %512 = vmatprep.subr.bf16.mxu1 %v615_v1  ;;  %v573_v11 = vld [vmem:[%s778_s1 + $0x70] sm:$0xff]   ;;  %v574_v12 = vld [vmem:[%s778_s1 + $0x78] sm:$0xff]   ;;  %s617_s18 = smov [#allocation2]   ;;  %vm417_vm2 = vcmask 58368  }
  0x16   :  { %v575_v13 = vld [vmem:[%s778_s1 + $0x80] sm:$0xff]   ;;  %v576_v14 = vld [vmem:[%s778_s1 + $0x88] sm:$0xff]   ;;  %v577_v15 = vld [vmem:[%s778_s1 + $0x90] sm:$0xff]  }
  0x17   :  { %523 = vmatpush3.bf16.msra.mxu0 %v575_v13  ;;  %v578_v16 = vld [vmem:[%s778_s1 + $0x98] sm:$0xff]   ;;  %v579_v17 = vld [vmem:[%s778_s1 + $0xa0] sm:$0xff]   ;;  %v580_v18 = vld [vmem:[%s778_s1 + $0xa8] sm:$0xff]  }
  0x18   :  { %513 = vmatpush3.bf16.msra.mxu1 %v572_v10  ;;  %524 = vmatprep.subr.bf16.mxu0 %v615_v1  ;;  %v433_v19 = vld [vmem:[%s779_s2] ss:$0 sm:$0xff]  ;;  %v581_v27 = vld [vmem:[%s778_s1 + $0xb0] sm:$0xff]   ;;  %v582_v28 = vld [vmem:[%s778_s1 + $0xb8] sm:$0xff]  }
  0x19   :  { %514 = vmatprep.subr.bf16.mxu1 %v615_v1  ;;  %v583_v29 = vld [vmem:[%s778_s1 + $0xc0] sm:$0xff]   ;;  %v584_v30 = vld [vmem:[%s778_s1 + $0xc8] sm:$0xff]   ;;  %v585_v31 = vld [vmem:[%s778_s1 + $0xd0] sm:$0xff]  }
  0x1a   :  { %v586_v32 = vld [vmem:[%s778_s1 + $0xd8] sm:$0xff]   ;;  %v587_v33 = vld [vmem:[%s778_s1 + $0xe0] sm:$0xff]   ;;  %v588_v34 = vld [vmem:[%s778_s1 + $0xe8] sm:$0xff]  }
  0x1b   :  { %525 = vmatpush3.bf16.msra.mxu0 %v576_v14  ;;  %v437_v35 = vld [vmem:[%s779_s2 + $0x1] ss:$0 sm:$0xff]  ;;  %v589_v43 = vld [vmem:[%s778_s1 + $0xf0] sm:$0xff]   ;;  %v590_v44 = vld [vmem:[%s778_s1 + $0xf8] sm:$0xff]   ;;  %s425_s1 = sshll.u32 %s617_s18, 4  ;;  %s426_s1 = int_to_ptr.vmem [resolvable:$true] %s425_s1 }
  0x1c   :  { %515 = vmatpush3.bf16.msra.mxu1 %v573_v11  ;;  %526 = vmatprep.subr.bf16.mxu0 %v615_v1  ;;  %v446_v45 = vld [vmem:[%s779_s2 + $0x2] ss:$0 sm:$0xff]  ;;  %v455_v53 = vld [vmem:[%s779_s2 + $0x3] ss:$0 sm:$0xff]  ;;  %s591_s19 = scalar_lea.vmem %s426_s1, 32  ;;  %p596_p1 = scmp.lt.s32.totalorder %s426_s1, %s426_s1 }
  0x1d   :  { %516 = vmatprep.subr.bf16.mxu1 %v615_v1  ;;  %p592_p0 = scmp.ne.s32.totalorder %s426_s1, %s591_s19  ;;  %p597_p2 = scmp.lt.s32.totalorder %s591_s19, %s591_s19 }
  0x1f   :  { %527 = vmatpush3.bf16.msra.mxu0 %v577_v15  ;;  %p598_p3 = por %p597_p2, %p596_p1 }
  0x20   :  { %517 = vmatpush3.bf16.msra.mxu1 %v574_v12  ;;  %528 = vmatprep.subr.bf16.mxu0 %v615_v1 }
  0x21   :  { %542 = vmatprep.subr.bf16.mxu1 %v615_v1  ;;  %p599_p4 = pnand %p598_p3, %p592_p0 }
  0x23   :  { %529 = vmatpush3.bf16.msra.mxu0 %v578_v16 }
  0x24   :  { %530 = vmatprep.subr.bf16.mxu0 %v615_v1 }
  0x27   :  { %531 = vmatpush3.bf16.msra.mxu0 %v579_v17 }
  0x28   :  { %532 = vmatprep.subr.bf16.mxu0 %v615_v1 }
  0x2b   :  { %533 = vmatpush3.bf16.msra.mxu0 %v580_v18 }
  0x2c   :  { %534 = vmatprep.subr.bf16.mxu0 %v615_v1 }
  0x2f   :  { %535 = vmatpush3.bf16.msra.mxu0 %v581_v27 }
  0x30   :  { %536 = vmatprep.subr.bf16.mxu0 %v615_v1 }
  0x33   :  { %537 = vmatpush3.bf16.msra.mxu0 %v582_v28 }
  0xdc   :  { %v77_v20 = vpop.f32.mrb[0].mxu0 }
  0xdd   :  { %v78_v21 = vadd.f32 %v433_v19, %v77_v20  ;;  %v500_v22 = vpop.f32.mrb[1].mxu0 }
  0xde   :  { %v80_v23 = vpop.f32.mrb[2].mxu0 }
  0xdf   :  { %v83_v24 = vmax.f32 %v78_v21, 0.0  ;;  %v501_v25 = vpop.f32.mrb[3].mxu0 }
  0xe1   :  { %v84_v26 = vpack.c.bf16 %v83_v24, %v83_v24 }
  0xe3   :  { %519 = vmatmul.mubr.bf16.vlgmr.msra.gmra.mrb[0].mxu1 %v84_v26 }
  0xe4   :  { %558 = vmatprep.mubr.msk.bf16.mxu1 %vm616_vm0, %v615_v1  ;;  %543 = vmatpush3.bf16.msra.mxu1 %v583_v29 }
  0xe5   :  { %544 = vmatprep.subr.bf16.mxu1 %v615_v1 }
  0xe8   :  { %545 = vmatpush3.bf16.msra.mxu1 %v584_v30 }
  0xe9   :  { %546 = vmatprep.subr.bf16.mxu1 %v615_v1 }
  0xec   :  { %547 = vmatpush3.bf16.msra.mxu1 %v585_v31 }
  0xed   :  { %548 = vmatprep.subr.bf16.mxu1 %v615_v1 }
  0xf0   :  { %549 = vmatpush3.bf16.msra.mxu1 %v586_v32 }
  0xf1   :  { %550 = vmatprep.subr.bf16.mxu1 %v615_v1 }
  0xf4   :  { %551 = vmatpush3.bf16.msra.mxu1 %v587_v33 }
  0xf5   :  { %552 = vmatprep.subr.bf16.mxu1 %v615_v1 }
  0xf8   :  { %553 = vmatpush3.bf16.msra.mxu1 %v588_v34 }
  0xf9   :  { %554 = vmatprep.subr.bf16.mxu1 %v615_v1 }
  0xfc   :  { %555 = vmatpush3.bf16.msra.mxu1 %v589_v43 }
  0xfd   :  { %556 = vmatprep.subr.bf16.mxu1 %v615_v1 }
 0x100   :  { %557 = vmatpush3.bf16.msra.mxu1 %v590_v44 }
 0x1b6   :  { %v188_v36 = vpop.f32.mrb[0].mxu1 }
 0x1b7   :  { %v189_v37 = vadd.f32 %v437_v35, %v188_v36  ;;  %v520_v38 = vpop.f32.mrb[1].mxu1 }
 0x1b8   :  { %v191_v39 = vpop.f32.mrb[2].mxu1 }
 0x1b9   :  { %v194_v40 = vmax.f32 %v189_v37, 0.0  ;;  %v521_v41 = vpop.f32.mrb[3].mxu1 }
 0x1bb   :  { %v195_v42 = vpack.c.bf16 %v194_v40, %v194_v40 }
 0x1bd   :  { %539 = vmatmul.mubr.bf16.vlgmr.msra.gmra.mrb[4].mxu0 %v195_v42 }
 0x290   :  { %v299_v46 = vpop.f32.mrb[4].mxu0 }
 0x291   :  { %v300_v47 = vadd.f32 %v446_v45, %v299_v46  ;;  %v540_v48 = vpop.f32.mrb[5].mxu0 }
 0x292   :  { %v302_v49 = vpop.f32.mrb[6].mxu0 }
 0x293   :  { %v305_v50 = vmax.f32 %v300_v47, 0.0  ;;  %v541_v51 = vpop.f32.mrb[7].mxu0 }
 0x295   :  { %v306_v52 = vpack.c.bf16 %v305_v50, %v305_v50 }
 0x297   :  { %559 = vmatmul.mubr.bf16.vlgmr.msra.gmra.mrb[4].mxu1 %v306_v52 }
 0x36a   :  { %v410_v54 = vpop.f32.mrb[4].mxu1 }
 0x36b   :  { %v411_v55 = vadd.f32 %v455_v53, %v410_v54  ;;  %v560_v56 = vpop.f32.mrb[5].mxu1 }
 0x36c   :  { %v413_v57 = vpop.f32.mrb[6].mxu1 }
 0x36d   :  { %v416_v58 = vmax.f32 %v411_v55, 0.0  ;;  %v561_v59 = vpop.f32.mrb[7].mxu1 }
 0x36f   :  { %418 = vst.msk [vmem:[#allocation2] sm:$0x3] %vm417_vm2, %v416_v58 }
 0x370   :  { %602 = shalt.err (!%p599_p4)
}
 0x371   :  { %s603_s21 = scalar_lea.hbm %s780_s3, 32 }
 0x372   :  { %p604_p5 = scmp.ne.s32.totalorder %s780_s3, %s603_s21  ;;  %p607_p6 = scmp.lt.u32.totalorder %s603_s21, %s780_s3 }
 0x374   :  { %p609_p7 = pnand %p607_p6, %p604_p5 }
 0x376   :  { %612 = shalt.err (!%p609_p7)
}
 0x377   :  { %428 = dma.vmem_to_hbm [thread:$0]  %s426_s1, 32, %s780_s3, [#allocation3]  }
 0x378   :  { %613 = dma.done.wait [#allocation3], 32  }
 0x379   :  { %614 = vsyncadd [#allocation3], 4294967264 }
 0x37a   :  { %432 = vsyncpa [#allocation3], 1 }

</bundles_post_ra>
